<compile_context>
chip_gen: v7x
topology: tpu7x:2x2x1
jax: 0.10.0
libtpu: 0.0.40
codegen_flags: <defaults>
</compile_context>

<pallas_src>
import jax
import jax.numpy as jnp
from jax.experimental import pallas as pl
from jax.experimental.pallas import tpu as pltpu


_LANE = 128
_TARGET_BLOCK_BYTES = 2 * 1024 * 1024   # ~2 MiB per x block: double-buffered
                                        # x + out + trigger stays well under
                                        # v5e's 16 MiB default scoped VMEM.
_TINY_BYPASS_BYTES = 256 * 1024         # below this, plain XLA add is cheaper.


def _trigger_add_kernel(x_ref, trig_ref, o_ref):
    # x_ref / o_ref: (TB, TN) lane-dense tile; trig_ref: (1, TN), broadcast
    # over the TB rows in one VPU-friendly broadcast.
    o_ref[...] = x_ref[...] + trig_ref[...]


def _pick_tiling(B, P, itemsize):
    """Pick (tb, tn) for the flattened (B, P) view.

    tn == P means "full row" blocks (1-D grid over batch; trigger DMA'd once
    for the whole kernel).  Otherwise (tb, tn) tiles, tn a multiple of 128,
    used with a cdiv grid and masked tail blocks (safe for elementwise add);
    batch is then the innermost grid axis so the trigger lane-tile is fetched
    only once per lane-tile.
    """
    # Dtype-aware sublane tile: bf16 packs [16,128] per vreg, int8/fp8 [32,128].
    tb_min = 8 * max(1, 4 // itemsize)
    row_bytes = P * itemsize

    # Whole problem fits in a single ~2 MiB block.
    if B * row_bytes <= _TARGET_BLOCK_BYTES:
        return B, P

    # Several full rows per block.
    target_rows = _TARGET_BLOCK_BYTES // row_bytes
    if target_rows >= tb_min:
        return (target_rows // tb_min) * tb_min, P

    # Row too large: tile the lane axis too (tn multiple of 128, < P here).
    tb = tb_min if B > tb_min else B
    chunks = max(1, _TARGET_BLOCK_BYTES // (tb * _LANE * itemsize))
    return tb, chunks * _LANE


def trigger_bound_forward(x, trigger, *, donate_x=False, use_pallas=None):
    """x: [B, C, H, W]; trigger: [C, H, W].  Returns x + trigger (broadcast)."""
    B, C, H, W = x.shape
    assert trigger.shape == (C, H, W)
    # PyTorch module uses f32 for both x and the trigger Parameter; keep the
    # kernel in x.dtype to avoid silent in-kernel promotion.
    trigger = trigger.astype(x.dtype)

    P = C * H * W
    itemsize = jnp.dtype(x.dtype).itemsize
    total_bytes = B * P * itemsize

    if use_pallas is None:
        use_pallas = total_bytes >= _TINY_BYPASS_BYTES
    if not use_pallas:
        # Launch + grid overhead dominates for tiny inputs; XLA's fused
        # elementwise add is already optimal there.
        return x + trigger[None, ...]

    # Lane-dense 2D views: broadcast over batch becomes a row-broadcast.
    x2 = x.reshape(B, P)
    t2 = trigger.reshape(1, P)

    tb, tn = _pick_tiling(B, P, itemsize)

    cost = pl.CostEstimate(
        flops=B * P,
        transcendentals=0,
        bytes_accessed=(2 * B * P + P) * itemsize,  # trigger read ~once
    )

    if tn == P:
        # Full-row blocks: 1-D grid over batch; trigger block index constant
        # -> DMA'd exactly once for the whole kernel.
        grid = (pl.cdiv(B, tb),)
        in_specs = [
            pl.BlockSpec((tb, P), lambda i: (i, 0)),
            pl.BlockSpec((1, P), lambda i: (0, 0)),
        ]
        out_spec = pl.BlockSpec((tb, P), lambda i: (i, 0))
        dims = ("parallel",)
    else:
        # Lane-tiled: batch is the innermost (fastest) grid axis so the
        # trigger lane-tile index is constant across it (one fetch per
        # lane-tile instead of one per grid step).
        grid = (pl.cdiv(P, tn), pl.cdiv(B, tb))
        in_specs = [
            pl.BlockSpec((tb, tn), lambda j, i: (i, j)),
            pl.BlockSpec((1, tn), lambda j, i: (0, j)),
        ]
        out_spec = pl.BlockSpec((tb, tn), lambda j, i: (i, j))
        dims = ("parallel", "parallel")

    out2 = pl.pallas_call(
        _trigger_add_kernel,
        out_shape=jax.ShapeDtypeStruct((B, P), x.dtype),
        grid_spec=pltpu.PrefetchScalarGridSpec(
            num_scalar_prefetch=0,
            grid=grid,
            in_specs=in_specs,
            out_specs=out_spec,
        ),
        compiler_params=pltpu.CompilerParams(dimension_semantics=dims),
        cost_estimate=cost,
        input_output_aliases=({0: 0} if donate_x else {}),
    )(x2, t2)

    return out2.reshape(B, C, H, W)


if __name__ == "__main__":
    # Deterministic synthetic setup mirroring __init__:
    #   trigger ~ U[0,1) of shape [3, image_size, image_size]
    # (eps / noise / mean / std are unused in forward).
    image_size = 16
    batch = 2

    key = jax.random.PRNGKey(0)
    k_x, k_trig = jax.random.split(key)

    x = jax.random.normal(k_x, (batch, 3, image_size, image_size), dtype=jnp.float32)
    trigger = jax.random.uniform(k_trig, (3, image_size, image_size), dtype=jnp.float32)

    # Force the Pallas path (this shape would otherwise hit the tiny-input
    # bypass) and check against the plain-JAX reference of the PyTorch forward.
    out = trigger_bound_forward(x, trigger, use_pallas=True)
    out = jax.block_until_ready(out)
    ref = x + trigger[None, ...]
    assert out.shape == x.shape
    assert jnp.allclose(out, ref, atol=1e-6), "mismatch vs reference (tiny case)"

    # A slightly larger case exercising the multi-row grid path.
    x2 = jax.random.normal(k_x, (48, 3, 32, 32), dtype=jnp.float32)
    trig2 = jax.random.uniform(k_trig, (3, 32, 32), dtype=jnp.float32)
    out2 = jax.block_until_ready(trigger_bound_forward(x2, trig2, use_pallas=True))
    assert jnp.allclose(out2, x2 + trig2[None, ...], atol=1e-6), "mismatch (medium case)"

    print("KERNEL_OK")
</pallas_src>

<mosaic_0001>
module attributes {stable_mosaic.version = 11 : i64} {
  func.func @_trigger_add_kernel(%arg0: i32, %arg1: memref<2x768xf32, #tpu.memory_space<vmem>>, %arg2: memref<1x768xf32, #tpu.memory_space<vmem>>, %arg3: memref<2x768xf32, #tpu.memory_space<vmem>>) attributes {dimension_semantics = [#tpu.dimension_semantics<parallel>], iteration_bounds = array<i64: 1>, scalar_prefetch = 0 : i64, scratch_operands = 0 : i64, tpu.core_type = #tpu.core_type<tc>, window_params = [{transform_indices = @transform_0, window_bounds = array<i64: 2, 768>}, {pipeline_mode = #tpu.pipeline_mode<synchronous>, transform_indices = @transform_1, window_bounds = array<i64: 1, 768>}, {transform_indices = @transform_2, window_bounds = array<i64: 2, 768>}]} {
    %c0 = arith.constant 0 : index
    %c0_0 = arith.constant 0 : index
    %0 = vector.load %arg1[%c0, %c0_0] : memref<2x768xf32, #tpu.memory_space<vmem>>, vector<2x768xf32>
    %c0_1 = arith.constant 0 : index
    %c0_2 = arith.constant 0 : index
    %1 = vector.load %arg2[%c0_1, %c0_2] : memref<1x768xf32, #tpu.memory_space<vmem>>, vector<1x768xf32>
    %2 = vector.broadcast %1 : vector<1x768xf32> to vector<2x768xf32>
    %3 = arith.addf %0, %2 : vector<2x768xf32>
    %c0_3 = arith.constant 0 : index
    %c0_4 = arith.constant 0 : index
    %4 = vector.load %arg3[%c0_3, %c0_4] : memref<2x768xf32, #tpu.memory_space<vmem>>, vector<2x768xf32>
    tpu.vector_store %arg3[%c0_3, %c0_4], %3 {strides = array<i32>} : memref<2x768xf32, #tpu.memory_space<vmem>>, vector<2x768xf32>,
    return
  }
  func.func @transform_0(%arg0: i32) -> (i32, i32) {
    %c0_i32 = arith.constant 0 : i32
    %c0_i32_0 = arith.constant 0 : i32
    return %arg0, %c0_i32 : i32, i32
  }
  func.func @transform_1(%arg0: i32) -> (i32, i32) {
    %c0_i32 = arith.constant 0 : i32
    %c0_i32_0 = arith.constant 0 : i32
    %c0_i32_1 = arith.constant 0 : i32
    return %c0_i32, %c0_i32_0 : i32, i32
  }
  func.func @transform_2(%arg0: i32) -> (i32, i32) {
    %c0_i32 = arith.constant 0 : i32
    %c0_i32_0 = arith.constant 0 : i32
    return %arg0, %c0_i32 : i32, i32
  }
}

</mosaic_0001>

<bundles_post_ra>
// kernel: tpu_custom_call.1
= control target key start
LH: loop header
LB: loop body
LE: loop exit
PB: predicated region body
PF: predicated region fallthrough
CT: control target
= control target key end

     0   :  { %7 = vsyncpa [#allocation3], 0  ;;  %s242_s0 = inlined_call_operand.hbm [shape: f32[2,768], index: 0, kind: input, shape index: {}]   ;;  %s243_s1 = inlined_call_operand.hbm [shape: f32[1,768], index: 1, kind: input, shape index: {}]   ;;  %s244_s2 = inlined_call_operand.hbm [shape: f32[2,768], index: 2, kind: output, shape index: {}]  }
   0x1   :  { %8 = vsyncpa [#allocation6], 0 }
   0x2   :  { %9 = vsyncpa [#allocation4], 0  ;;  %s187_s9 = smov [#allocation2]   ;;  %s188_s11 = smov [#allocation5]  }
   0x3   :  { %s16_s10 = sshll.u32 %s187_s9, 4  ;;  %s26_s12 = sshll.u32 %s188_s11, 4  ;;  %s17_s10 = int_to_ptr.vmem [resolvable:$true] %s16_s10  ;;  %s27_s12 = int_to_ptr.vmem [resolvable:$true] %s26_s12 }
   0x4   :  { %s115_s15 = scalar_lea.hbm %s242_s0, 192 }
   0x5   :  { %p116_p0 = scmp.ne.s32.totalorder %s242_s0, %s115_s15  ;;  %p119_p1 = scmp.lt.u32.totalorder %s115_s15, %s242_s0 }
   0x7   :  { %p121_p2 = pnand %p119_p1, %p116_p0 }
   0x9   :  { %124 = shalt.err (!%p121_p2)
}
   0xa   :  { %s125_s20 = scalar_lea.vmem %s17_s10, 192  ;;  %p130_p4 = scmp.lt.s32.totalorder %s17_s10, %s17_s10 }
   0xb   :  { %p126_p3 = scmp.ne.s32.totalorder %s17_s10, %s125_s20  ;;  %p131_p5 = scmp.lt.s32.totalorder %s125_s20, %s125_s20 }
   0xd   :  { %p132_p6 = por %p131_p5, %p130_p4 }
   0xf   :  { %p133_p7 = pnand %p132_p6, %p126_p3 }
  0x11   :  { %136 = shalt.err (!%p133_p7)
}
  0x12   :  { %19 = dma.hbm_to_vmem [thread:$0]  %s242_s0, 192, %s17_s10, [#allocation3]  }
  0x13   :  { %s137_s25 = scalar_lea.hbm %s243_s1, 96 }
  0x14   :  { %p138_p8 = scmp.ne.s32.totalorder %s243_s1, %s137_s25  ;;  %p141_p9 = scmp.lt.u32.totalorder %s137_s25, %s243_s1 }
  0x16   :  { %p143_p10 = pnand %p141_p9, %p138_p8 }
  0x18   :  { %146 = shalt.err (!%p143_p10)
}
  0x19   :  { %s147_s30 = scalar_lea.vmem %s27_s12, 96  ;;  %p152_p12 = scmp.lt.s32.totalorder %s27_s12, %s27_s12 }
  0x1a   :  { %p148_p11 = scmp.ne.s32.totalorder %s27_s12, %s147_s30  ;;  %p153_p13 = scmp.lt.s32.totalorder %s147_s30, %s147_s30 }
  0x1c   :  { %p154_p0 = por %p153_p13, %p152_p12 }
  0x1e   :  { %p155_p1 = pnand %p154_p0, %p148_p11 }
  0x20   :  { %158 = shalt.err (!%p155_p1)
}
  0x21   :  { %29 = dma.hbm_to_vmem [thread:$0]  %s243_s1, 96, %s27_s12, [#allocation6]  }
  0x22   :  { %181 = dma.done.wait [#allocation3], 192  }
  0x23   :  { %182 = vsyncadd [#allocation3], 4294967104 }
  0x24   :  { %183 = dma.done.wait [#allocation6], 96  }
  0x25   :  { %184 = vsyncadd [#allocation6], 4294967200  ;;  %v40_v0 = vlaneseq  ;;  %v189_v1 = vmov 1983009808   ;;  %v38_v11 = vld [vmem:[#allocation5] sm:$0x3f] }
  0x26   :  { %v67_v2 = vunpack.c.l.s4 %v189_v1  ;;  %v37_v24 = vld [vmem:[#allocation2 + $0x8] sm:$0xf]  ;;  %v36_v25 = vld [vmem:[#allocation2] sm:$0xff]  ;;  %s190_s1 = smov [#allocation7]  }
  0x27   :  { %v41_v3 = vshrl.u32 %v40_v0, 7  ;;  %s101_s4 = sshll.u32 %s190_s1, 4  ;;  %s102_s4 = int_to_ptr.vmem [resolvable:$true] %s101_s4 }
  0x28   :  { %v68_v4 = vunpack.c.0.s8 %v67_v2  ;;  %s159_s5 = scalar_lea.vmem %s102_s4, 192  ;;  %p164_p3 = scmp.lt.s32.totalorder %s102_s4, %s102_s4 }
  0x29   :  { %v42_v5 = vsub.s32 0, %v41_v3  ;;  %v46_v6 = vsub.s32 1, %v41_v3  ;;  %v50_v7 = vsub.s32 2, %v41_v3  ;;  %v54_v8 = vsub.s32 3, %v41_v3  ;;  %p160_p2 = scmp.ne.s32.totalorder %s102_s4, %s159_s5  ;;  %p165_p4 = scmp.lt.s32.totalorder %s159_s5, %s159_s5 }
  0x2a   :  { %v58_v9 = vsub.s32 4, %v41_v3  ;;  %v62_v10 = vsub.s32 5, %v41_v3  ;;  %v71_v12 = vsub.s32 %v68_v4, %v41_v3 }
  0x2b   :  { %v43_v13 = vrot.slane %v38_v11, %v42_v5  ;;  %v47_v14 = vrot.slane %v38_v11, %v46_v6  ;;  %v51_v15 = vrot.slane %v38_v11, %v50_v7  ;;  %v55_v16 = vrot.slane %v38_v11, %v54_v8  ;;  %p166_p5 = por %p165_p4, %p164_p3 }
  0x2c   :  { %v59_v17 = vrot.slane %v38_v11, %v58_v9  ;;  %v63_v18 = vrot.slane %v38_v11, %v62_v10 }
  0x2d   :  { %v64_v19 = vcombine.low %v43_v13, %v47_v14  ;;  %v65_v20 = vcombine.low %v51_v15, %v55_v16  ;;  %p167_p6 = pnand %p166_p5, %p160_p2 }
  0x2e   :  { %v81_v21 = vcombine.low %v59_v17, %v63_v18 }
  0x2f   :  { %v72_v22 = vrot.slane %v64_v19, %v71_v12  ;;  %v79_v23 = vrot.slane %v65_v20, %v71_v12 }
  0x30   :  { %v88_v26 = vrot.slane %v81_v21, %v71_v12 }
  0x31   :  { %v80_v27 = vcombine.low %v72_v22, %v79_v23 }
  0x32   :  { %v92_v28 = vadd.f32 %v88_v26, %v37_v24 }
  0x33   :  { %v91_v29 = vadd.f32 %v80_v27, %v36_v25 }
  0x34   :  { %94 = vst [vmem:[#allocation7 + $0x8] sm:$0xf] %v92_v28 }
  0x35   :  { %93 = vst [vmem:[#allocation7] sm:$0xff] %v91_v29 }
  0x36   :  { %170 = shalt.err (!%p167_p6)
}
  0x37   :  { %s171_s8 = scalar_lea.hbm %s244_s2, 192 }
  0x38   :  { %p172_p7 = scmp.ne.s32.totalorder %s244_s2, %s171_s8  ;;  %p175_p8 = scmp.lt.u32.totalorder %s171_s8, %s244_s2 }
  0x3a   :  { %p177_p9 = pnand %p175_p8, %p172_p7 }
  0x3c   :  { %180 = shalt.err (!%p177_p9)
}
  0x3d   :  { %104 = dma.vmem_to_hbm [thread:$0]  %s102_s4, 192, %s244_s2, [#allocation4]  }
  0x3e   :  { %185 = dma.done.wait [#allocation4], 192  }
  0x3f   :  { %186 = vsyncadd [#allocation4], 4294967104 }
  0x40   :  { %108 = vsyncpa [#allocation3], 1 }
  0x41   :  { %109 = vsyncpa [#allocation6], 1 }
  0x42   :  { %110 = vsyncpa [#allocation4], 1 }

</bundles_post_ra>
